<compile_context>
chip_gen: v7x
topology: tpu7x:2x2x1
jax: 0.10.0
libtpu: 0.0.40
codegen_flags: <defaults>
</compile_context>

<pallas_src>
import jax
import jax.numpy as jnp
from jax.experimental import pallas as pl
from jax.experimental.pallas import tpu as pltpu


def _bsde_mlp_kernel(u_ref,
                     w1_ref, b1_ref, w2_ref, b2_ref,
                     w3_ref, b3_ref, w4_ref, b4_ref,
                     out_ref):
    # All activations are (features, TB): batch on the 128-lane axis.
    u = u_ref[...]                                               # (6, TB)

    h = jnp.dot(w1_ref[...], u, preferred_element_type=jnp.float32) + b1_ref[...]
    h = jnp.maximum(h, 0.0)
    h = jnp.dot(w2_ref[...], h, preferred_element_type=jnp.float32) + b2_ref[...]
    h = jnp.maximum(h, 0.0)
    h = jnp.dot(w3_ref[...], h, preferred_element_type=jnp.float32) + b3_ref[...]
    h = jnp.maximum(h, 0.0)
    y = jnp.dot(w4_ref[...], h, preferred_element_type=jnp.float32) + b4_ref[...]  # (2, TB)

    # u rows (with d_x = 2): [x0, x1, r, s, R, S].
    # beta = maximum(cat(r, s), minimum(cat(R, S), y)) -> one lane-dense store.
    d_x = u.shape[0] - 4
    lower = u[d_x:d_x + 2, :]        # (2, TB): rows r, s
    upper = u[d_x + 2:d_x + 4, :]    # (2, TB): rows R, S
    out_ref[...] = jnp.maximum(lower, jnp.minimum(upper, y))


def prepare_params(torch_params, dim_y=1, dim_d=1):
    """Convert PyTorch-layout params (W: (out, in), b: (out,)) to kernel layout.

    W1's columns are permuted from PyTorch order [x, r, R, s, S] to the
    kernel's u-row order [x, r, s, R, S]; biases become (out, 1) columns that
    broadcast over the lane (batch) axis.  Done once, outside the kernel.
    """
    w1, b1, w2, b2, w3, b3, w4, b4 = torch_params
    d_x = dim_y + dim_d
    col = lambda b: b.reshape(-1, 1)
    w1p = jnp.concatenate(
        [w1[:, :d_x],                     # x columns
         w1[:, d_x:d_x + 1],              # r
         w1[:, d_x + 2:d_x + 3],          # s
         w1[:, d_x + 1:d_x + 2],          # R
         w1[:, d_x + 3:d_x + 4]],         # S
        axis=1)
    return (w1p, col(b1), w2, col(b2), w3, col(b3), w4, col(b4))


def _round_up(v, m):
    return ((v + m - 1) // m) * m


def bsde_beta_forward(x, r, R, s, S, kparams, *, block_b=4096,
                      lane_major_out=False):
    """Pallas equivalent of Model.forward.

    x: (B, dim_y+dim_d); r, R, s, S: (B, 1); kparams from prepare_params.
    Returns beta of shape (B, dim_y+dim_d) (PyTorch orientation) unless
    lane_major_out=True, in which case the lane-major (dim_y+dim_d, B) result
    is returned directly (saves a full-output transpose pass for downstream
    consumers that can take it).
    """
    B, d_x = x.shape
    d_in = d_x + 4
    dim_h = kparams[2].shape[0]               # w2: (H, H)
    d_out = kparams[-2].shape[0]              # w4: (d_out, H)

    # Lane-tile: as large as block_b allows, but keep >= 4 grid steps so the
    # "parallel" axis feeds both v7x TensorCores and each core still
    # double-buffers.  Multiples of 128 keep interior tiles lane-aligned.
    tb = min(block_b, max(128, _round_up(pl.cdiv(B, 4), 128)))

    # One lane-major per-step operand: rows [x..., r, s, R, S].
    u_t = jnp.concatenate([x, r, s, R, S], axis=1).T      # (d_in, B)

    grid = (pl.cdiv(B, tb),)

    in_specs = [pl.BlockSpec((d_in, tb), lambda i: (0, i))]
    # Weights/biases: full blocks, constant index_map -> fetched once, resident.
    in_specs += [pl.BlockSpec(p.shape, lambda i: (0, 0)) for p in kparams]

    flops_per_sample = 2 * (d_in * dim_h + dim_h * dim_h + dim_h * dim_h
                            + dim_h * d_out)
    param_bytes = sum(int(p.size) for p in kparams) * 4
    cost = pl.CostEstimate(flops=flops_per_sample * B,
                           bytes_accessed=B * (d_in + d_out) * 4 + param_bytes,
                           transcendentals=0)

    out_t = pl.pallas_call(
        _bsde_mlp_kernel,
        out_shape=jax.ShapeDtypeStruct((d_out, B), jnp.float32),
        grid=grid,
        in_specs=in_specs,
        out_specs=pl.BlockSpec((d_out, tb), lambda i: (0, i)),
        compiler_params=pltpu.CompilerParams(
            dimension_semantics=("parallel",)),
        cost_estimate=cost,
    )(u_t, *kparams)

    if lane_major_out:
        return out_t                          # (d_out, B), lane-major
    return out_t.T                            # (B, d_out), PyTorch orientation


def init_params(key, dim_y=1, dim_d=1, dim_h=32):
    """Synthetic init mirroring the PyTorch module (W: (out, in), b: (out,)).

    Weights: Kaiming-normal std = sqrt(2 / fan_in); biases: nn.Linear default
    uniform(-1/sqrt(fan_in), 1/sqrt(fan_in)).
    """
    d_in = dim_y + dim_d + 4
    d_out = dim_y + dim_d
    dims = [(d_in, dim_h), (dim_h, dim_h), (dim_h, dim_h), (dim_h, d_out)]
    params = []
    for (fi, fo) in dims:
        key, kw, kb = jax.random.split(key, 3)
        w = jax.random.normal(kw, (fo, fi), jnp.float32) * jnp.sqrt(2.0 / fi)
        b = jax.random.uniform(kb, (fo,), jnp.float32,
                               minval=-1.0 / jnp.sqrt(fi), maxval=1.0 / jnp.sqrt(fi))
        params.extend([w, b])
    return tuple(params)


if __name__ == "__main__":
    dim_y, dim_d, dim_h = 1, 1, 32
    B = 1024          # tb caps at 256 here -> 4 grid steps, exercises pipelining.

    key = jax.random.PRNGKey(0)
    kx, kr, kR, ks, kS, kp = jax.random.split(key, 6)

    x = jax.random.normal(kx, (B, dim_y + dim_d), jnp.float32)
    r = jax.random.normal(kr, (B, 1), jnp.float32)
    R = r + jnp.abs(jax.random.normal(kR, (B, 1), jnp.float32)) + 0.1  # upper > lower
    s = jax.random.normal(ks, (B, 1), jnp.float32)
    S = s + jnp.abs(jax.random.normal(kS, (B, 1), jnp.float32)) + 0.1

    torch_params = init_params(kp, dim_y, dim_d, dim_h)
    kparams = prepare_params(torch_params, dim_y, dim_d)

    fwd = jax.jit(lambda x, r, R, s, S, p: bsde_beta_forward(x, r, R, s, S, p,
                                                             block_b=4096))
    beta = fwd(x, r, R, s, S, kparams)
    beta = jax.block_until_ready(beta)

    # Plain-JAX reference of the same math (PyTorch orientation).
    w1, b1, w2, b2, w3, b3, w4, b4 = torch_params
    u = jnp.concatenate([x, r, R, s, S], axis=1)
    h = jnp.maximum(u @ w1.T + b1, 0.0)
    h = jnp.maximum(h @ w2.T + b2, 0.0)
    h = jnp.maximum(h @ w3.T + b3, 0.0)
    ref = jnp.maximum(jnp.concatenate([r, s], -1),
                      jnp.minimum(jnp.concatenate([R, S], -1), h @ w4.T + b4))

    assert beta.shape == (B, dim_y + dim_d)
    assert jnp.allclose(beta, ref, atol=1e-4, rtol=1e-4), \
        float(jnp.max(jnp.abs(beta - ref)))

    print("KERNEL_OK")
</pallas_src>

<mosaic_0001>
module attributes {stable_mosaic.version = 11 : i64} {
  func.func @_bsde_mlp_kernel(%arg0: i32, %arg1: memref<6x256xf32, #tpu.memory_space<vmem>>, %arg2: memref<32x6xf32, #tpu.memory_space<vmem>>, %arg3: memref<32x1xf32, #tpu.memory_space<vmem>>, %arg4: memref<32x32xf32, #tpu.memory_space<vmem>>, %arg5: memref<32x1xf32, #tpu.memory_space<vmem>>, %arg6: memref<32x32xf32, #tpu.memory_space<vmem>>, %arg7: memref<32x1xf32, #tpu.memory_space<vmem>>, %arg8: memref<2x32xf32, #tpu.memory_space<vmem>>, %arg9: memref<2x1xf32, #tpu.memory_space<vmem>>, %arg10: memref<2x256xf32, #tpu.memory_space<vmem>>) attributes {dimension_semantics = [#tpu.dimension_semantics<parallel>], iteration_bounds = array<i64: 4>, scalar_prefetch = 0 : i64, scratch_operands = 0 : i64, tpu.core_type = #tpu.core_type<tc>, window_params = [{transform_indices = @transform_0, window_bounds = array<i64: 6, 256>}, {pipeline_mode = #tpu.pipeline_mode<synchronous>, transform_indices = @transform_1, window_bounds = array<i64: 32, 6>}, {pipeline_mode = #tpu.pipeline_mode<synchronous>, transform_indices = @transform_2, window_bounds = array<i64: 32, 1>}, {pipeline_mode = #tpu.pipeline_mode<synchronous>, transform_indices = @transform_3, window_bounds = array<i64: 32, 32>}, {pipeline_mode = #tpu.pipeline_mode<synchronous>, transform_indices = @transform_4, window_bounds = array<i64: 32, 1>}, {pipeline_mode = #tpu.pipeline_mode<synchronous>, transform_indices = @transform_5, window_bounds = array<i64: 32, 32>}, {pipeline_mode = #tpu.pipeline_mode<synchronous>, transform_indices = @transform_6, window_bounds = array<i64: 32, 1>}, {pipeline_mode = #tpu.pipeline_mode<synchronous>, transform_indices = @transform_7, window_bounds = array<i64: 2, 32>}, {pipeline_mode = #tpu.pipeline_mode<synchronous>, transform_indices = @transform_8, window_bounds = array<i64: 2, 1>}, {transform_indices = @transform_9, window_bounds = array<i64: 2, 256>}]} {
    %c0 = arith.constant 0 : index
    %c0_0 = arith.constant 0 : index
    %0 = vector.load %arg1[%c0, %c0_0] : memref<6x256xf32, #tpu.memory_space<vmem>>, vector<6x256xf32>
    %c0_1 = arith.constant 0 : index
    %c0_2 = arith.constant 0 : index
    %1 = vector.load %arg2[%c0_1, %c0_2] : memref<32x6xf32, #tpu.memory_space<vmem>>, vector<32x6xf32>
    %cst = arith.constant dense<0.000000e+00> : vector<32x256xf32>
    %2 = tpu.matmul %1, %0, %cst {dimension_numbers = #tpu.dot_dimension_numbers<[1], [0], [0], [1], [0, 0, 1, 1], [], []>} : vector<32x6xf32>, vector<6x256xf32>, vector<32x256xf32> -> vector<32x256xf32>
    %c0_3 = arith.constant 0 : index
    %c0_4 = arith.constant 0 : index
    %3 = vector.load %arg3[%c0_3, %c0_4] : memref<32x1xf32, #tpu.memory_space<vmem>>, vector<32x1xf32>
    %4 = vector.broadcast %3 : vector<32x1xf32> to vector<32x256xf32>
    %5 = arith.addf %2, %4 : vector<32x256xf32>
    %cst_5 = arith.constant 0.000000e+00 : f32
    %6 = vector.broadcast %cst_5 : f32 to vector<32x256xf32>
    %7 = arith.maximumf %5, %6 : vector<32x256xf32>
    %c0_6 = arith.constant 0 : index
    %c0_7 = arith.constant 0 : index
    %8 = vector.load %arg4[%c0_6, %c0_7] : memref<32x32xf32, #tpu.memory_space<vmem>>, vector<32x32xf32>
    %cst_8 = arith.constant dense<0.000000e+00> : vector<32x256xf32>
    %9 = tpu.matmul %8, %7, %cst_8 {dimension_numbers = #tpu.dot_dimension_numbers<[1], [0], [0], [1], [0, 0, 1, 1], [], []>} : vector<32x32xf32>, vector<32x256xf32>, vector<32x256xf32> -> vector<32x256xf32>
    %c0_9 = arith.constant 0 : index
    %c0_10 = arith.constant 0 : index
    %10 = vector.load %arg5[%c0_9, %c0_10] : memref<32x1xf32, #tpu.memory_space<vmem>>, vector<32x1xf32>
    %11 = vector.broadcast %10 : vector<32x1xf32> to vector<32x256xf32>
    %12 = arith.addf %9, %11 : vector<32x256xf32>
    %cst_11 = arith.constant 0.000000e+00 : f32
    %13 = vector.broadcast %cst_11 : f32 to vector<32x256xf32>
    %14 = arith.maximumf %12, %13 : vector<32x256xf32>
    %c0_12 = arith.constant 0 : index
    %c0_13 = arith.constant 0 : index
    %15 = vector.load %arg6[%c0_12, %c0_13] : memref<32x32xf32, #tpu.memory_space<vmem>>, vector<32x32xf32>
    %cst_14 = arith.constant dense<0.000000e+00> : vector<32x256xf32>
    %16 = tpu.matmul %15, %14, %cst_14 {dimension_numbers = #tpu.dot_dimension_numbers<[1], [0], [0], [1], [0, 0, 1, 1], [], []>} : vector<32x32xf32>, vector<32x256xf32>, vector<32x256xf32> -> vector<32x256xf32>
    %c0_15 = arith.constant 0 : index
    %c0_16 = arith.constant 0 : index
    %17 = vector.load %arg7[%c0_15, %c0_16] : memref<32x1xf32, #tpu.memory_space<vmem>>, vector<32x1xf32>
    %18 = vector.broadcast %17 : vector<32x1xf32> to vector<32x256xf32>
    %19 = arith.addf %16, %18 : vector<32x256xf32>
    %cst_17 = arith.constant 0.000000e+00 : f32
    %20 = vector.broadcast %cst_17 : f32 to vector<32x256xf32>
    %21 = arith.maximumf %19, %20 : vector<32x256xf32>
    %c0_18 = arith.constant 0 : index
    %c0_19 = arith.constant 0 : index
    %22 = vector.load %arg8[%c0_18, %c0_19] : memref<2x32xf32, #tpu.memory_space<vmem>>, vector<2x32xf32>
    %cst_20 = arith.constant dense<0.000000e+00> : vector<2x256xf32>
    %23 = tpu.matmul %22, %21, %cst_20 {dimension_numbers = #tpu.dot_dimension_numbers<[1], [0], [0], [1], [0, 0, 1, 1], [], []>} : vector<2x32xf32>, vector<32x256xf32>, vector<2x256xf32> -> vector<2x256xf32>
    %c0_21 = arith.constant 0 : index
    %c0_22 = arith.constant 0 : index
    %24 = vector.load %arg9[%c0_21, %c0_22] : memref<2x1xf32, #tpu.memory_space<vmem>>, vector<2x1xf32>
    %25 = vector.broadcast %24 : vector<2x1xf32> to vector<2x256xf32>
    %26 = arith.addf %23, %25 : vector<2x256xf32>
    %27 = vector.extract_strided_slice %0 {offsets = [2, 0], sizes = [2, 256], strides = [1, 1]} : vector<6x256xf32> to vector<2x256xf32>
    %28 = vector.extract_strided_slice %0 {offsets = [4, 0], sizes = [2, 256], strides = [1, 1]} : vector<6x256xf32> to vector<2x256xf32>
    %29 = arith.minimumf %28, %26 : vector<2x256xf32>
    %30 = arith.maximumf %27, %29 : vector<2x256xf32>
    %c0_23 = arith.constant 0 : index
    %c0_24 = arith.constant 0 : index
    %31 = vector.load %arg10[%c0_23, %c0_24] : memref<2x256xf32, #tpu.memory_space<vmem>>, vector<2x256xf32>
    tpu.vector_store %arg10[%c0_23, %c0_24], %30 {strides = array<i32>} : memref<2x256xf32, #tpu.memory_space<vmem>>, vector<2x256xf32>,
    return
  }
  func.func @transform_0(%arg0: i32) -> (i32, i32) {
    %c0_i32 = arith.constant 0 : i32
    %c0_i32_0 = arith.constant 0 : i32
    return %c0_i32, %arg0 : i32, i32
  }
  func.func @transform_1(%arg0: i32) -> (i32, i32) {
    %c0_i32 = arith.constant 0 : i32
    %c0_i32_0 = arith.constant 0 : i32
    %c0_i32_1 = arith.constant 0 : i32
    return %c0_i32, %c0_i32_0 : i32, i32
  }
  func.func @transform_2(%arg0: i32) -> (i32, i32) {
    %c0_i32 = arith.constant 0 : i32
    %c0_i32_0 = arith.constant 0 : i32
    %c0_i32_1 = arith.constant 0 : i32
    return %c0_i32, %c0_i32_0 : i32, i32
  }
  func.func @transform_3(%arg0: i32) -> (i32, i32) {
    %c0_i32 = arith.constant 0 : i32
    %c0_i32_0 = arith.constant 0 : i32
    %c0_i32_1 = arith.constant 0 : i32
    return %c0_i32, %c0_i32_0 : i32, i32
  }
  func.func @transform_4(%arg0: i32) -> (i32, i32) {
    %c0_i32 = arith.constant 0 : i32
    %c0_i32_0 = arith.constant 0 : i32
    %c0_i32_1 = arith.constant 0 : i32
    return %c0_i32, %c0_i32_0 : i32, i32
  }
  func.func @transform_5(%arg0: i32) -> (i32, i32) {
    %c0_i32 = arith.constant 0 : i32
    %c0_i32_0 = arith.constant 0 : i32
    %c0_i32_1 = arith.constant 0 : i32
    return %c0_i32, %c0_i32_0 : i32, i32
  }
  func.func @transform_6(%arg0: i32) -> (i32, i32) {
    %c0_i32 = arith.constant 0 : i32
    %c0_i32_0 = arith.constant 0 : i32
    %c0_i32_1 = arith.constant 0 : i32
    return %c0_i32, %c0_i32_0 : i32, i32
  }
  func.func @transform_7(%arg0: i32) -> (i32, i32) {
    %c0_i32 = arith.constant 0 : i32
    %c0_i32_0 = arith.constant 0 : i32
    %c0_i32_1 = arith.constant 0 : i32
    return %c0_i32, %c0_i32_0 : i32, i32
  }
  func.func @transform_8(%arg0: i32) -> (i32, i32) {
    %c0_i32 = arith.constant 0 : i32
    %c0_i32_0 = arith.constant 0 : i32
    %c0_i32_1 = arith.constant 0 : i32
    return %c0_i32, %c0_i32_0 : i32, i32
  }
  func.func @transform_9(%arg0: i32) -> (i32, i32) {
    %c0_i32 = arith.constant 0 : i32
    %c0_i32_0 = arith.constant 0 : i32
    return %c0_i32, %arg0 : i32, i32
  }
}

</mosaic_0001>

<bundles_post_ra>
// kernel: _lambda_.1
= control target key start
LH: loop header
LB: loop body
LE: loop exit
PB: predicated region body
PF: predicated region fallthrough
CT: control target
= control target key end

     0   :  { %14 = vsyncpa [#allocation3], 0  ;;  %s1371_s0 = inlined_call_operand.vmem [shape: f32[6,1024], index: 0, kind: input, shape index: {}]   ;;  %s1372_s1 = inlined_call_operand.vmem [shape: f32[32,6], index: 1, kind: input, shape index: {}]   ;;  %s1373_s2 = inlined_call_operand.vmem [shape: f32[32,1], index: 2, kind: input, shape index: {}]   ;;  %s1374_s3 = inlined_call_operand.vmem [shape: f32[32,32], index: 3, kind: input, shape index: {}]   ;;  %s1375_s4 = inlined_call_operand.vmem [shape: f32[32,1], index: 4, kind: input, shape index: {}]   ;;  %s1376_s5 = inlined_call_operand.vmem [shape: f32[32,32], index: 5, kind: input, shape index: {}]   ;;  %s1377_s6 = inlined_call_operand.vmem [shape: f32[32,1], index: 6, kind: input, shape index: {}]   ;;  %s1378_s7 = inlined_call_operand.vmem [shape: f32[2,32], index: 7, kind: input, shape index: {}]   ;;  %s1379_s8 = inlined_call_operand.vmem [shape: f32[2,1], index: 8, kind: input, shape index: {}]   ;;  %s1380_s9 = inlined_call_operand.hbm [shape: f32[2,1024], index: 9, kind: output, shape index: {}]  }
   0x1   :  { %16 = vsyncpa [#allocation3 + $0x1], 0  ;;  %s1156_s30 = smov 0   ;;  %s1158_s10 = smov 0  }
   0x2   :  { %s1160_s11 = smov 0   ;;  %s1162_s12 = smov 0  }
   0x3 LB: > { %s1177_s13 = sadd.s32 4294967295, %s1100_s12   ;;  %s940_s14 = sadd.s32 4294967294, %s1100_s12   ;;  %s1100_s12 = sphi %s1162_s12, %s1386_s12   ;;  %s1096_s11 = sphi %s1160_s11, %s1385_s11   ;;  %s1092_s10 = sphi %s1158_s10, %s1384_s10   ;;  %s1088_s30 = sphi %s1156_s30, %s1383_s30  }
   0x4   : > { %s1181_s15 = sadd.s32 1, %s1100_s12   ;;  %s223_s16 = sadd.s32 1, %s1096_s11 }
   0x5   : > { %s220_s17 = ssub.s32 %s1100_s12, %s1181_s15  ;;  %p233_p0 = scmp.ne.s32.totalorder %s1096_s11, %s1092_s10 }
   0x6   : > { %p221_p1 = scmp.eq.s32.totalorder %s220_s17, 0  ;;  %p234_p2 = scmp.eq.s32.totalorder %s1177_s13, 3 }
   0x7   : > { %p239_p3 = scmp.ne.s32.totalorder %s1092_s10, %s1088_s30  ;;  %p240_p4 = scmp.eq.s32.totalorder %s940_s14, 3 }
   0x8   : > { %s1192_s18 = scalar_select %p221_p1, %s1096_s11, %s223_s16  }
   0x9   : > { %p1194_p5 = por %p234_p2, %p233_p0  ;;  %p1198_p6 = por %p240_p4, %p239_p3 }
   0xa   : > { %p943_p7 = scmp.ge.s32.totalorder %s1100_s12, 1  ;;  %p291_p8 = scmp.lt.s32.totalorder %s1100_s12, 5 }
   0xc   : > { %p292_p9 = pnand %p943_p7, %p291_p8 }
   0xd   : > { %s945_s21 = sshll.u32 (!%p292_p9), %s1177_s13, 1  ;;  %v1102_v0 = vmov (!%p292_p9), 0.0   ;;  %v340_v1 = vld [vmem:[%s1373_s2] sm:$0xff] (!%p292_p9)  ;;  %v1103_v2 = vmov (!%p292_p9), 0   ;;  %v342_v3 = vld [vmem:[%s1373_s2 + $0x10] sm:$0xff] (!%p292_p9)  ;;  %v341_v4 = vld [vmem:[%s1373_s2 + $0x8] sm:$0xff] (!%p292_p9) }
   0xe   : > { %295 = sbr.rel (%p292_p9) target bundleno = 971 (0x3cb), region = 56  ;;  %p328_p10 = scmp.lt.s32.totalorder (!%p292_p9), %s945_s21, 7  ;;  %448 = vmatprep.mubr.f32.mxu0 (!%p292_p9), %v1102_v0  ;;  %460 = vmatprep.mubr.f32.mxu1 (!%p292_p9), %v1102_v0  ;;  %v343_v5 = vld [vmem:[%s1373_s2 + $0x18] sm:$0xff] (!%p292_p9)  ;;  %vm377_vm0 = vcmask (!%p292_p9), 1045504   ;;  %v336_v6 = vld [vmem:[%s1372_s1] sm:$0xff] (!%p292_p9)  ;;  %vm364_vm1 = vcmask (!%p292_p9), 48128  }
   0xf   : > { %1036 = vset.pattern.permute.xlu0 (!%p292_p9), %v1103_v2  ;;  %1037 = vset.pattern.permute.xlu1 (!%p292_p9), %v1103_v2  ;;  %v338_v9 = vld [vmem:[%s1372_s1 + $0x10] sm:$0xff] (!%p292_p9)  ;;  %v485_v10 = vld [vmem:[%s1375_s4] sm:$0xff] (!%p292_p9)  ;;  %v486_v11 = vld [vmem:[%s1375_s4 + $0x8] sm:$0xff] (!%p292_p9)  ;;  %vm509_vm2 = vcmask (!%p292_p9), 261120   ;;  %s967_s17 = sshll.u32 (!%p292_p9), %s1177_s13, 6  ;;  %s1105_s13 = smov (!%p292_p9), [#allocation2]  }
  0x10   : > { %346 = vperm.xlu0 (!%p292_p9), %1036, %v340_v1   ;;  %356 = vperm.xlu1 (!%p292_p9), %1037, %v342_v3   ;;  %v337_v12 = vld [vmem:[%s1372_s1 + $0x8] sm:$0xff] (!%p292_p9)  ;;  %v339_v13 = vld [vmem:[%s1372_s1 + $0x18] sm:$0xff] (!%p292_p9)  ;;  %v487_v14 = vld [vmem:[%s1375_s4 + $0x10] sm:$0xff] (!%p292_p9)  ;;  %s1329_s26 = scalar_lea.hbm (!%p292_p9), %s1380_s9, %s967_s17  ;;  %s1042_s28 = sshll.u32 (!%p292_p9), %s1105_s13, 4  ;;  %s1043_s28 = int_to_ptr.vmem [resolvable:$false] %s1042_s28 }
  0x11   : > { %v488_v15 = vld [vmem:[%s1375_s4 + $0x18] sm:$0xff] (!%p292_p9)  ;;  %v623_v16 = vld [vmem:[%s1377_s6] sm:$0xff] (!%p292_p9)  ;;  %v624_v17 = vld [vmem:[%s1377_s6 + $0x8] sm:$0xff] (!%p292_p9)  ;;  %s1044_s29 = scalar_lea.vmem (!%p292_p9), %s1043_s28, 128 }
  0x12   : > { %v625_v18 = vld [vmem:[%s1377_s6 + $0x10] sm:$0xff] (!%p292_p9)  ;;  %v626_v19 = vld [vmem:[%s1377_s6 + $0x18] sm:$0xff] (!%p292_p9)  ;;  %v757_v20 = vld [vmem:[%s1379_s8] sm:$0x3] (!%p292_p9) }
  0x13   : > { %v481_v53 = vld [vmem:[%s1374_s3] sm:$0xff] (!%p292_p9)  ;;  %v482_v54 = vld [vmem:[%s1374_s3 + $0x8] sm:$0xff] (!%p292_p9)  ;;  %v483_v55 = vld [vmem:[%s1374_s3 + $0x10] sm:$0xff] (!%p292_p9) }
  0x14   : > { %351 = vperm.xlu0 (!%p292_p9), %1036, %v341_v4   ;;  %361 = vperm.xlu1 (!%p292_p9), %1037, %v343_v5   ;;  %v484_v56 = vld [vmem:[%s1374_s3 + $0x18] sm:$0xff] (!%p292_p9) }
  0x15   : > { %s1388_s21 = smov (!%p328_p10, %s945_s21), 7 }
  0x16   : > { %s946_s14 = sshll.u32 %s1388_s21, 3 }
  0x17   : > { %s331_s22 = scalar_lea.vmem %s1371_s0, %s946_s14  ;;  %s324_s14 = sand.u32 1, %s1092_s10  }
  0x18   : > { %v1225_v7 = vld [vmem:[%s331_s22 + $0x8] sm:$0x3f]  ;;  %v1227_v8 = vld [vmem:[%s331_s22] sm:$0x3f]  ;;  %491 = vperm.xlu0 %1036, %v485_v10   ;;  %496 = vperm.xlu1 %1037, %v486_v11   ;;  %s944_s16 = sshll.u32 %s324_s14, 2  ;;  %s867_s21 = scalar_lea.sflag [#allocation3], %s324_s14 }
  0x19   : > { %947 = vmatprep.subr.msk.mxu0 %vm377_vm0, %v1225_v7  ;;  %992 = vmatprep.subr.msk.mxu1 %vm377_vm0, %v1225_v7  ;;  %s326_s22 = scalar_lea.vmem [#allocation2], %s944_s16 }
  0x1a   : > { %948 = vmatpush1.msk.msra.mxu0 %vm377_vm0, %v1227_v8  ;;  %993 = vmatpush1.msk.msra.mxu1 %vm377_vm0, %v1227_v8  ;;  %s881_s23 = sshll.u32 %s326_s22, 4  ;;  %s1331_s23 = int_to_ptr.vmem [resolvable:$true] %s881_s23 }
  0x1b   : > { %949 = vmatmul.mubr.msk.f32.vlgmr.msra.gmra.mrb[0].mxu0 %vm364_vm1, %v336_v6  ;;  %951 = vmatmul.mubr.msk.f32.vlgmr.msra.gmra.mrb[0].mxu1 %vm364_vm1, %v338_v9  ;;  %s1038_s27 = scalar_lea.vmem %s1331_s23, 64  ;;  %p1045_p0 = scmp.lt.s32.totalorder %s1331_s23, %s1043_s28 }
  0x1c   : > { %454 = vmatprep.mubr.f32.mxu0 %v1102_v0  ;;  %466 = vmatprep.mubr.f32.mxu1 %v1102_v0  ;;  %p1039_p11 = scmp.ne.s32.totalorder %s1331_s23, %s1038_s27  ;;  %p1046_p1 = scmp.lt.s32.totalorder %s1044_s29, %s1038_s27 }
  0x1d   : > { %501 = vperm.xlu0 %1036, %v487_v14   ;;  %506 = vperm.xlu1 %1037, %v488_v15  }
  0x1e   : > { %p1040_p12 = pnand %p1039_p11, %p1194_p5  ;;  %p1047_p2 = por %p1046_p1, %p1045_p0 }
  0x1f   : > { %950 = vmatmul.mubr.msk.f32.gmra.mrb[2].mxu0 %vm364_vm1, %v337_v12  ;;  %952 = vmatmul.mubr.msk.f32.gmra.mrb[2].mxu1 %vm364_vm1, %v339_v13 }
  0x20   : > { %586 = vmatprep.mubr.f32.mxu1 %v1102_v0  ;;  %723 = vmatprep.mubr.f32.mxu0 %v1102_v0  ;;  %p1041_p13 = pneg %p1040_p12 }
  0x21   : > { %629 = vperm.xlu0 %1036, %v623_v16   ;;  %634 = vperm.xlu1 %1037, %v624_v17  }
  0x22   : > { %p1048_p3 = pnand %p1047_p2, %p1041_p13 }
  0x25   : > { %639 = vperm.xlu0 %1036, %v625_v18   ;;  %644 = vperm.xlu1 %1037, %v626_v19  }
  0x29   : > { %760 = vperm.xlu0 %1036, %v757_v20  }
  0x8f   : > { %v347_v21 = vpop.permute.xlu0 %346  ;;  %v357_v22 = vpop.permute.xlu1 %356 }
  0x93   : > { %v352_v29 = vpop.permute.xlu0 %351  ;;  %v362_v30 = vpop.permute.xlu1 %361 }
  0x97   : > { %v492_v59 = vpop.permute.xlu0 %491  ;;  %v497_v61 = vpop.permute.xlu1 %496 }
  0x9c   : > { %v502_v13 = vpop.permute.xlu0 %501  ;;  %v507_v16 = vpop.permute.xlu1 %506 }
  0xee   : > { %v450_v23 = vpop.f32.mrb[0].mxu0  ;;  %v462_v24 = vpop.f32.mrb[0].mxu1 }
  0xef   : > { %v452_v25 = vpop.f32.mrb[1].mxu0  ;;  %v463_v26 = vadd.f32 %v462_v24, %v357_v22  ;;  %v464_v27 = vpop.f32.mrb[1].mxu1  ;;  %v451_v31 = vadd.f32 %v450_v23, %v347_v21 }
  0xf0   : > { %v465_v28 = vadd.f32 %v464_v27, %v357_v22  ;;  %v453_v32 = vadd.f32 %v452_v25, %v347_v21 }
  0xf1   : > { %v477_v35 = vmax.f32 %v463_v26, 0.0  ;;  %v473_v43 = vmax.f32 %v451_v31, 0.0  ;;  %v622_v31 = vld [vmem:[%s1376_s5 + $0x18] sm:$0xff] }
  0xf2   : > { %v456_v33 = vpop.f32.mrb[2].mxu0  ;;  %v468_v34 = vpop.f32.mrb[2].mxu1  ;;  %v478_v40 = vmax.f32 %v465_v28, 0.0  ;;  %v474_v46 = vmax.f32 %v453_v32, 0.0  ;;  %v619_v28 = vld [vmem:[%s1376_s5] sm:$0xff] }
  0xf3   : > { %v457_v36 = vadd.f32 %v456_v33, %v352_v29  ;;  %v469_v37 = vadd.f32 %v468_v34, %v362_v30  ;;  %v458_v38 = vpop.f32.mrb[3].mxu0  ;;  %v470_v39 = vpop.f32.mrb[3].mxu1 }
  0xf4   : > { %v459_v41 = vadd.f32 %v458_v38, %v352_v29  ;;  %v471_v42 = vadd.f32 %v470_v39, %v362_v30  ;;  %v620_v29 = vld [vmem:[%s1376_s5 + $0x8] sm:$0xff]  ;;  %v621_v30 = vld [vmem:[%s1376_s5 + $0x10] sm:$0xff]  ;;  %v630_v34 = vpop.permute.xlu0 %629 }
  0xf5   : > { %v475_v44 = vmax.f32 %v457_v36, 0.0  ;;  %v479_v45 = vmax.f32 %v469_v37, 0.0  ;;  %v635_v36 = vpop.permute.xlu1 %634 }
  0xf6   : > { %v476_v47 = vmax.f32 %v459_v41, 0.0  ;;  %v480_v48 = vmax.f32 %v471_v42, 0.0 }
  0xf7   : > { %v970_v49 = vpack.c.bf16 %v475_v44, %v473_v43  ;;  %v974_v50 = vpack.c.bf16 %v479_v45, %v477_v35 }
  0xf8   : > { %v968_v51 = vpack.c.bf16 %v476_v47, %v474_v46  ;;  %v972_v52 = vpack.c.bf16 %v480_v48, %v478_v40  ;;  %v640_v48 = vpop.permute.xlu0 %639 }
  0xfa   : > { %969 = vmatprep.subr.bf16.mxu1 %v968_v51  ;;  %v645_v51 = vpop.permute.xlu1 %644 }
  0xfb   : > { %971 = vmatpush1.bf16.msra.mxu1 %v970_v49 }
  0xfc   : > { %973 = vmatprep.subr.bf16.mxu1 %v972_v52 }
  0xff   : > { %975 = vmatpush1.bf16.msra.mxu1 %v974_v50 }
 0x102   : > { %953 = vmatmul.mubr.msk.f32.vlgmr.msra.gmra.mrb[4].mxu1 %vm509_vm2, %v481_v53 }
 0x103   : > { %592 = vmatprep.mubr.f32.mxu1 %v1102_v0 }
 0x106   : > { %954 = vmatmul.mubr.msk.f32.gmra.mrb[6].mxu1 %vm509_vm2, %v482_v54 }
 0x107   : > { %598 = vmatprep.mubr.f32.mxu1 %v1102_v0 }
 0x10a   : > { %955 = vmatmul.mubr.msk.f32.gmra.mrb[8].mxu1 %vm509_vm2, %v483_v55 }
 0x10b   : > { %604 = vmatprep.mubr.f32.mxu1 %v1102_v0 }
 0x10e   : > { %956 = vmatmul.mubr.msk.f32.gmra.mrb[10].mxu1 %vm509_vm2, %v484_v56 }
 0x10f   : > { %830 = vmatprep.mubr.f32.mxu1 %v1102_v0 }
 0x1d5   : > { %v588_v57 = vpop.f32.mrb[4].mxu1 }
 0x1d6   : > { %v590_v58 = vpop.f32.mrb[5].mxu1  ;;  %v589_v60 = vadd.f32 %v588_v57, %v492_v59 }
 0x1d7   : > { %v591_v62 = vadd.f32 %v590_v58, %v492_v59 }
 0x1d8   : > { %v611_v4 = vmax.f32 %v589_v60, 0.0 }
 0x1d9   : > { %v594_v63 = vpop.f32.mrb[6].mxu1  ;;  %v612_v6 = vmax.f32 %v591_v62, 0.0 }
 0x1da   : > { %v595_v1 = vadd.f32 %v594_v63, %v497_v61  ;;  %v596_v2 = vpop.f32.mrb[7].mxu1  ;;  %v756_v63 = vld [vmem:[%s1378_s7] sm:$0x3] }
 0x1db   : > { %v597_v3 = vadd.f32 %v596_v2, %v497_v61 }
 0x1dc   : > { %v613_v5 = vmax.f32 %v595_v1, 0.0  ;;  %v761_v1 = vpop.permute.xlu0 %760 }
 0x1dd   : > { %v614_v9 = vmax.f32 %v597_v3, 0.0  ;;  %v600_v10 = vpop.f32.mrb[8].mxu1 }
 0x1de   : > { %v978_v11 = vpack.c.bf16 %v613_v5, %v611_v4  ;;  %v602_v12 = vpop.f32.mrb[9].mxu1  ;;  %v601_v15 = vadd.f32 %v600_v10, %v502_v13  ;;  %v859_v10 = vlaneseq }
 0x1df   : > { %v976_v14 = vpack.c.bf16 %v614_v9, %v612_v6  ;;  %v603_v17 = vadd.f32 %v602_v12, %v502_v13  ;;  %v1104_v6 = vmov 1983009808  }
 0x1e0   : > { %v615_v22 = vmax.f32 %v601_v15, 0.0  ;;  %v857_v9 = vunpack.c.l.s4 %v1104_v6 }
 0x1e1   : > { %v606_v18 = vpop.f32.mrb[10].mxu1  ;;  %977 = vmatprep.subr.bf16.mxu0 %v976_v14  ;;  %v616_v24 = vmax.f32 %v603_v17, 0.0 }
 0x1e2   : > { %v607_v19 = vadd.f32 %v606_v18, %v507_v16  ;;  %v608_v20 = vpop.f32.mrb[11].mxu1  ;;  %979 = vmatpush1.bf16.msra.mxu0 %v978_v11  ;;  %v858_v15 = vunpack.c.0.s8 %v857_v9 }
 0x1e3   : > { %v609_v21 = vadd.f32 %v608_v20, %v507_v16  ;;  %v860_v16 = vshrl.u32 %v859_v10, 7 }
 0x1e4   : > { %v617_v23 = vmax.f32 %v607_v19, 0.0 }
 0x1e5   : > { %v618_v25 = vmax.f32 %v609_v21, 0.0  ;;  %v861_v21 = vsub.s32 %v858_v15, %v860_v16 }
 0x1e6   : > { %v982_v26 = vpack.c.bf16 %v617_v23, %v615_v22 }
 0x1e7   : > { %v980_v27 = vpack.c.bf16 %v618_v25, %v616_v24 }
 0x1e9   : > { %981 = vmatprep.subr.bf16.mxu0 %v980_v27 }
 0x1ea   : > { %983 = vmatpush1.bf16.msra.mxu0 %v982_v26 }
 0x1ed   : > { %957 = vmatmul.mubr.msk.f32.vlgmr.msra.gmra.mrb[4].mxu0 %vm509_vm2, %v619_v28 }
 0x1ee   : > { %729 = vmatprep.mubr.f32.mxu0 %v1102_v0 }
 0x1f1   : > { %958 = vmatmul.mubr.msk.f32.gmra.mrb[6].mxu0 %vm509_vm2, %v620_v29 }
 0x1f2   : > { %735 = vmatprep.mubr.f32.mxu0 %v1102_v0 }
 0x1f5   : > { %959 = vmatmul.mubr.msk.f32.gmra.mrb[8].mxu0 %vm509_vm2, %v621_v30 }
 0x1f6   : > { %741 = vmatprep.mubr.f32.mxu0 %v1102_v0 }
 0x1f9   : > { %960 = vmatmul.mubr.msk.f32.gmra.mrb[10].mxu0 %vm509_vm2, %v622_v31 }
 0x2c0   : > { %v725_v32 = vpop.f32.mrb[4].mxu0 }
 0x2c1   : > { %v727_v33 = vpop.f32.mrb[5].mxu0  ;;  %v726_v35 = vadd.f32 %v725_v32, %v630_v34 }
 0x2c2   : > { %v728_v37 = vadd.f32 %v727_v33, %v630_v34 }
 0x2c3   : > { %v748_v42 = vmax.f32 %v726_v35, 0.0 }
 0x2c4   : > { %v731_v38 = vpop.f32.mrb[6].mxu0  ;;  %v749_v44 = vmax.f32 %v728_v37, 0.0 }
 0x2c5   : > { %v732_v39 = vadd.f32 %v731_v38, %v635_v36  ;;  %v733_v40 = vpop.f32.mrb[7].mxu0 }
 0x2c6   : > { %v734_v41 = vadd.f32 %v733_v40, %v635_v36 }
 0x2c7   : > { %v750_v43 = vmax.f32 %v732_v39, 0.0 }
 0x2c8   : > { %v751_v0 = vmax.f32 %v734_v41, 0.0  ;;  %v737_v45 = vpop.f32.mrb[8].mxu0 }
 0x2c9   : > { %v986_v46 = vpack.c.bf16 %v750_v43, %v748_v42  ;;  %v739_v47 = vpop.f32.mrb[9].mxu0  ;;  %v738_v50 = vadd.f32 %v737_v45, %v640_v48 }
 0x2ca   : > { %v984_v49 = vpack.c.bf16 %v751_v0, %v749_v44  ;;  %v740_v52 = vadd.f32 %v739_v47, %v640_v48 }
 0x2cb   : > { %v752_v57 = vmax.f32 %v738_v50, 0.0 }
 0x2cc   : > { %v743_v53 = vpop.f32.mrb[10].mxu0  ;;  %985 = vmatprep.subr.bf16.mxu1 %v984_v49  ;;  %v753_v59 = vmax.f32 %v740_v52, 0.0 }
 0x2cd   : > { %v744_v54 = vadd.f32 %v743_v53, %v645_v51  ;;  %v745_v55 = vpop.f32.mrb[11].mxu0  ;;  %987 = vmatpush1.bf16.msra.mxu1 %v986_v46 }
 0x2ce   : > { %v746_v56 = vadd.f32 %v745_v55, %v645_v51 }
 0x2cf   : > { %v754_v58 = vmax.f32 %v744_v54, 0.0 }
 0x2d0   : > { %v755_v60 = vmax.f32 %v746_v56, 0.0 }
 0x2d1   : > { %v990_v61 = vpack.c.bf16 %v754_v58, %v752_v57 }
 0x2d2   : > { %v988_v62 = vpack.c.bf16 %v755_v60, %v753_v59 }
 0x2d4   : > { %989 = vmatprep.subr.bf16.mxu1 %v988_v62 }
 0x2d5   : > { %991 = vmatpush1.bf16.msra.mxu1 %v990_v61 }
 0x2d8   : > { %961 = vmatmul.mubr.msk.f32.vlgmr.msra.gmra.mrb[12].mxu1 %vm509_vm2, %v756_v63 }
 0x3ab   : > { %v832_v2 = vpop.f32.mrb[12].mxu1 }
 0x3ac   : > { %v833_v3 = vadd.f32 %v832_v2, %v761_v1  ;;  %v834_v4 = vpop.f32.mrb[13].mxu1 }
 0x3ad   : > { %v835_v5 = vadd.f32 %v834_v4, %v761_v1 }
 0x3ae   : > { %v839_v11 = vrot.slane %v833_v3, 4 }
 0x3af   : > { %v840_v12 = vrot.slane %v835_v5, 4 }
 0x3b0   : > { %v843_v13 = vmin.f32 %v1227_v8, %v839_v11 }
 0x3b1   : > { %v844_v14 = vmin.f32 %v1225_v7, %v840_v12 }
 0x3b2   : > { %v847_v17 = vrot.slane %v843_v13, 2 }
 0x3b3   : > { %v848_v18 = vrot.slane %v844_v14, 2 }
 0x3b4   : > { %v851_v19 = vmax.f32 %v1227_v8, %v847_v17 }
 0x3b5   : > { %v852_v20 = vmax.f32 %v1225_v7, %v848_v18 }
 0x3b7   : > { %v855_v22 = vcombine.low %v851_v19, %v852_v20 }
 0x3b9   : > { %v862_v23 = vrot.slane %v855_v22, %v861_v21 }
 0x3bb   : > { %v863_v24 = vcombine.high %v862_v23, %v862_v23 }
 0x3bd   : > { %865 = vst [vmem:[%s326_s22] sm:$0xf] %v863_v24 }
 0x3be   : > { %1051 = shalt.err (!%p1048_p3)
}
 0x3bf   : > { %s1052_s14 = scalar_lea.hbm %s1329_s26, 64  ;;  %s1056_s22 = scalar_lea.hbm %s1380_s9, 256 }
 0x3c0   : > { %p1053_p4 = scmp.ne.s32.totalorder %s1329_s26, %s1052_s14  ;;  %p1057_p9 = scmp.lt.u32.totalorder %s1329_s26, %s1380_s9 }
 0x3c1   : > { %p1058_p10 = scmp.lt.u32.totalorder %s1056_s22, %s1052_s14  ;;  %p1060_p12 = scmp.lt.u32.totalorder %s1052_s14, %s1329_s26 }
 0x3c2   : > { %p1054_p7 = pnand %p1053_p4, %p1194_p5 }
 0x3c3   : > { %p1059_p11 = por %p1058_p10, %p1057_p9 }
 0x3c4   : > { %p1055_p8 = pneg %p1054_p7 }
 0x3c5   : > { %p1061_p13 = por %p1060_p12, %p1059_p11 }
 0x3c7   : > { %p1062_p0 = pnand %p1061_p13, %p1055_p8 }
 0x3c9   : > { %1065 = shalt.err (!%p1062_p0)
}
 0x3ca   : > { %994 = dma.vmem_to_hbm [thread:$0]  (%p1194_p5), %s1331_s23, 64, %s1329_s26, %s867_s21  }
 0x3cb PF: > { %p1000_p1 = scmp.ge.s32.totalorder %s1100_s12, 2  ;;  %s893_s27 = sand.u32 1, %s1088_s30  }
 0x3cc   : > { %s894_s13 = scalar_lea.sflag [#allocation3], %s893_s27 }
 0x3cd   : > { %p997_p2 = pnand %p1000_p1, %p1198_p6 }
 0x3cf   : > { %1083 = dma.done.wait (!%p997_p2), %s894_s13, 64  }
 0x3d0   : > { %1085 = vsyncadd (!%p997_p2), %s894_s13, 4294967232  ;;  %p19_p3 = scmp.ge.s32.totalorder %s1181_s15, 6   ;;  %s1383_s30 = smov %s1092_s10 }
 0x3d1   : > { %s1384_s10 = smov %s1096_s11  ;;  %s1385_s11 = smov %s1192_s18 }
 0x3d2   : > { %s1386_s12 = smov %s1181_s15  ;;  %21 = sbr.rel (!%p19_p3) target bundleno = 3 (0x3), region = 91 }
 0x3d9   :  { %899 = vsyncpa [#allocation3], 1 }
 0x3da   :  { %901 = vsyncpa [#allocation3 + $0x1], 1 }

</bundles_post_ra>
